<compile_context>
chip_gen: v7x
topology: tpu7x:2x2x1
jax: 0.10.0
libtpu: 0.0.40
codegen_flags: <defaults>
</compile_context>

<pallas_src>
import functools

import jax
import jax.numpy as jnp
from jax.experimental import pallas as pl
from jax.experimental.pallas import tpu as pltpu

INPUT_DIM = 10
HIDDEN_DIM = 50
OUTPUT_DIM = 1
NUM_EXPERTS = 3
BATCH = 64

LANE = 128  # TPU lane width; each expert's hidden slab is padded to this


def _moe_kernel(x_ref, wall_ref, ball_ref, w2c_ref, b2_ref, o_ref,
                *, n_experts, hid_pad):
    b = x_ref.shape[0]
    eh = n_experts * hid_pad                     # total expert-hidden lanes

    xb = x_ref[...].astype(jnp.bfloat16)         # MXU operands in bf16

    # ONE lane-dense MXU matmul computes every expert's fc1 activations AND the
    # gating logits (gating weights occupy the trailing 128-lane slab):
    #   (B, in) @ (in, E*hid_pad + 128) -> f32 accumulation, fused bias-row add.
    acts = jnp.dot(xb, wall_ref[...], preferred_element_type=jnp.float32) + ball_ref[...]

    h = jnp.maximum(acts[:, :eh], 0.0)           # fc1 bias+ReLU in f32 (VPU)
    logits = acts[:, eh:eh + n_experts]          # gating logits (B, E)

    # Numerically stable softmax; reciprocal on the EUP (separate issue slot).
    m = jnp.max(logits, axis=-1, keepdims=True)
    eg = jnp.exp(logits - m)
    gates = eg * pl.reciprocal(jnp.sum(eg, axis=-1, keepdims=True), approx=True)

    # Second Linear (out_dim == 1): VPU multiply + per-expert 128-lane-aligned
    # reductions (padded lanes hold zero weights), then gate-weighted combine.
    prod = h * w2c_ref[...]                      # (B, E*hid_pad) f32
    out = jnp.zeros((b, 1), jnp.float32)
    for e in range(n_experts):                   # static unroll, E is tiny
        y_e = jnp.sum(prod[:, e * hid_pad:(e + 1) * hid_pad], axis=-1, keepdims=True)
        y_e = y_e + b2_ref[e]                    # SMEM scalar bias
        out = out + gates[:, e:e + 1] * y_e
    o_ref[...] = out.astype(o_ref.dtype)


@jax.jit
def moe_forward(x, w1, b1, w2, b2, wg, bg):
    """MoE forward.

    x:  (B, in)            w1: (E, in, hid)   b1: (E, hid)
    w2: (E, hid, out=1)    b2: (E, out=1)     wg: (in, E)    bg: (E,)
    Weight layouts are already transposed vs. PyTorch nn.Linear (stored (in, out)).
    """
    n_experts, in_dim, hid = w1.shape
    out_dim = w2.shape[-1]
    assert out_dim == 1, "kernel specializes the out_dim == 1 case of the module"
    batch = x.shape[0]
    hid_pad = LANE * pl.cdiv(hid, LANE)
    eh = n_experts * hid_pad
    cols = eh + LANE                             # expert slabs + gating slab

    # --- weight repacking (layout plumbing, outside the kernel hot path) ---
    # fc1 of all experts (each padded to a 128-lane boundary) and the gating
    # weights concatenated along the lane axis; bf16 for the MXU.
    w1p = jnp.zeros((n_experts, in_dim, hid_pad), jnp.float32).at[:, :, :hid].set(w1)
    w1_cat = jnp.transpose(w1p, (1, 0, 2)).reshape(in_dim, eh)
    w_all = jnp.zeros((in_dim, cols), jnp.float32)
    w_all = w_all.at[:, :eh].set(w1_cat)
    w_all = w_all.at[:, eh:eh + n_experts].set(wg)
    w_all = w_all.astype(jnp.bfloat16)

    # Combined f32 bias row: fc1 biases per expert slab + gating bias.
    b1p = jnp.zeros((n_experts, hid_pad), jnp.float32).at[:, :hid].set(b1)
    b_all = jnp.zeros((1, cols), jnp.float32)
    b_all = b_all.at[0, :eh].set(b1p.reshape(-1))
    b_all = b_all.at[0, eh:eh + n_experts].set(bg)

    # fc2 columns (out_dim == 1) flattened into one f32 row; zeros in pad lanes.
    w2_cat = jnp.zeros((n_experts, hid_pad), jnp.float32).at[:, :hid].set(w2[:, :, 0])
    w2_cat = w2_cat.reshape(1, eh)
    b2_vec = b2.reshape(n_experts)               # SMEM scalars

    kernel = functools.partial(_moe_kernel, n_experts=n_experts, hid_pad=hid_pad)

    # Entire problem fits trivially in VMEM on v5e/v6e/v7x -> single invocation,
    # no grid, no per-expert launch overhead.
    return pl.pallas_call(
        kernel,
        out_shape=jax.ShapeDtypeStruct((batch, out_dim), x.dtype),
        in_specs=[
            pl.BlockSpec(memory_space=pltpu.VMEM),     # x
            pl.BlockSpec(memory_space=pltpu.VMEM),     # w_all  (bf16: fc1 + gate)
            pl.BlockSpec(memory_space=pltpu.VMEM),     # b_all  (f32 bias row)
            pl.BlockSpec(memory_space=pltpu.VMEM),     # w2_cat (f32)
            pl.BlockSpec(memory_space=pltpu.SMEM),     # b2 scalars
        ],
        out_specs=pl.BlockSpec(memory_space=pltpu.VMEM),
    )(x, w_all, b_all, w2_cat, b2_vec)


def moe_reference(x, w1, b1, w2, b2, wg, bg):
    """Pure-JAX f32 reference mirroring the PyTorch MixtureOfExperts forward."""
    h = jnp.maximum(jnp.einsum("bi,eih->beh", x, w1) + b1[None], 0.0)
    eo = jnp.einsum("beh,eho->beo", h, w2) + b2[None]           # (B, E, 1)
    gates = jax.nn.softmax(x @ wg + bg[None, :], axis=-1)       # (B, E)
    return jnp.sum(gates[:, :, None] * eo, axis=1)              # (B, 1)


def init_params(key):
    # nn.Linear-style init: U(-1/sqrt(fan_in), 1/sqrt(fan_in)).
    k1, k2, k3, k4, k5, k6 = jax.random.split(key, 6)
    bnd1 = 1.0 / (INPUT_DIM ** 0.5)
    bnd2 = 1.0 / (HIDDEN_DIM ** 0.5)
    w1 = jax.random.uniform(k1, (NUM_EXPERTS, INPUT_DIM, HIDDEN_DIM), jnp.float32, -bnd1, bnd1)
    b1 = jax.random.uniform(k2, (NUM_EXPERTS, HIDDEN_DIM), jnp.float32, -bnd1, bnd1)
    w2 = jax.random.uniform(k3, (NUM_EXPERTS, HIDDEN_DIM, OUTPUT_DIM), jnp.float32, -bnd2, bnd2)
    b2 = jax.random.uniform(k4, (NUM_EXPERTS, OUTPUT_DIM), jnp.float32, -bnd2, bnd2)
    wg = jax.random.uniform(k5, (INPUT_DIM, NUM_EXPERTS), jnp.float32, -bnd1, bnd1)
    bg = jax.random.uniform(k6, (NUM_EXPERTS,), jnp.float32, -bnd1, bnd1)
    return w1, b1, w2, b2, wg, bg


if __name__ == "__main__":
    key = jax.random.PRNGKey(0)
    kx, kp = jax.random.split(key)
    x = jax.random.normal(kx, (BATCH, INPUT_DIM), jnp.float32)
    w1, b1, w2, b2, wg, bg = init_params(kp)

    out = moe_forward(x, w1, b1, w2, b2, wg, bg)
    jax.block_until_ready(out)

    ref = moe_reference(x, w1, b1, w2, b2, wg, bg)
    assert out.shape == (BATCH, OUTPUT_DIM)
    # bf16 MXU operands with f32 accumulation (+ approx reciprocal in softmax)
    # -> loosened tolerance vs. the pure-f32 reference.
    assert jnp.allclose(out, ref, atol=2e-2, rtol=2e-2), float(jnp.max(jnp.abs(out - ref)))
    print("KERNEL_OK")
</pallas_src>

<mosaic_0001>
module attributes {stable_mosaic.version = 11 : i64} {
  func.func @_moe_kernel(%arg0: memref<64x10xf32, #tpu.memory_space<vmem>>, %arg1: memref<10x512xbf16, #tpu.memory_space<vmem>>, %arg2: memref<1x512xf32, #tpu.memory_space<vmem>>, %arg3: memref<1x384xf32, #tpu.memory_space<vmem>>, %arg4: memref<3xf32, #tpu.memory_space<smem>>, %arg5: memref<64x1xf32, #tpu.memory_space<vmem>>) attributes {dimension_semantics = [], scalar_prefetch = 0 : i64, scratch_operands = 0 : i64, tpu.core_type = #tpu.core_type<tc>} {
    %c0 = arith.constant 0 : index
    %c0_0 = arith.constant 0 : index
    %0 = vector.load %arg0[%c0, %c0_0] : memref<64x10xf32, #tpu.memory_space<vmem>>, vector<64x10xf32>
    %1 = arith.truncf %0 : vector<64x10xf32> to vector<64x10xbf16>
    %c0_1 = arith.constant 0 : index
    %c0_2 = arith.constant 0 : index
    %2 = vector.load %arg1[%c0_1, %c0_2] : memref<10x512xbf16, #tpu.memory_space<vmem>>, vector<10x512xbf16>
    %cst = arith.constant dense<0.000000e+00> : vector<64x512xf32>
    %3 = tpu.matmul %1, %2, %cst {dimension_numbers = #tpu.dot_dimension_numbers<[1], [0], [0], [1], [0, 0, 1, 1], [], []>} : vector<64x10xbf16>, vector<10x512xbf16>, vector<64x512xf32> -> vector<64x512xf32>
    %c0_3 = arith.constant 0 : index
    %c0_4 = arith.constant 0 : index
    %4 = vector.load %arg2[%c0_3, %c0_4] : memref<1x512xf32, #tpu.memory_space<vmem>>, vector<1x512xf32>
    %5 = vector.broadcast %4 : vector<1x512xf32> to vector<64x512xf32>
    %6 = arith.addf %3, %5 : vector<64x512xf32>
    %7 = vector.extract_strided_slice %6 {offsets = [0, 0], sizes = [64, 384], strides = [1, 1]} : vector<64x512xf32> to vector<64x384xf32>
    %cst_5 = arith.constant 0.000000e+00 : f32
    %8 = vector.broadcast %cst_5 : f32 to vector<64x384xf32>
    %9 = arith.maximumf %7, %8 : vector<64x384xf32>
    %10 = vector.extract_strided_slice %6 {offsets = [0, 384], sizes = [64, 3], strides = [1, 1]} : vector<64x512xf32> to vector<64x3xf32>
    %cst_6 = arith.constant dense<0xFF800000> : vector<64xf32>
    %11 = vector.multi_reduction <maximumf>, %10, %cst_6 [1] : vector<64x3xf32> to vector<64xf32>
    %12 = vector.shape_cast %11 : vector<64xf32> to vector<64x1xf32>
    %13 = vector.broadcast %12 : vector<64x1xf32> to vector<64x3xf32>
    %14 = arith.subf %10, %13 : vector<64x3xf32>
    %15 = math.exp %14 : vector<64x3xf32>
    %cst_7 = arith.constant dense<0.000000e+00> : vector<64xf32>
    %16 = vector.multi_reduction <add>, %15, %cst_7 [1] : vector<64x3xf32> to vector<64xf32>
    %17 = vector.shape_cast %16 : vector<64xf32> to vector<64x1xf32>
    %18 = tpu.reciprocal %17 {approx = true} : vector<64x1xf32> -> vector<64x1xf32>
    %19 = vector.broadcast %18 : vector<64x1xf32> to vector<64x3xf32>
    %20 = arith.mulf %15, %19 : vector<64x3xf32>
    %c0_8 = arith.constant 0 : index
    %c0_9 = arith.constant 0 : index
    %21 = vector.load %arg3[%c0_8, %c0_9] : memref<1x384xf32, #tpu.memory_space<vmem>>, vector<1x384xf32>
    %22 = vector.broadcast %21 : vector<1x384xf32> to vector<64x384xf32>
    %23 = arith.mulf %9, %22 : vector<64x384xf32>
    %cst_10 = arith.constant 0.000000e+00 : f32
    %24 = vector.broadcast %cst_10 : f32 to vector<64x1xf32>
    %25 = vector.extract_strided_slice %23 {offsets = [0, 0], sizes = [64, 128], strides = [1, 1]} : vector<64x384xf32> to vector<64x128xf32>
    %cst_11 = arith.constant dense<0.000000e+00> : vector<64xf32>
    %26 = vector.multi_reduction <add>, %25, %cst_11 [1] : vector<64x128xf32> to vector<64xf32>
    %27 = vector.shape_cast %26 : vector<64xf32> to vector<64x1xf32>
    %c0_12 = arith.constant 0 : index
    %28 = memref.load %arg4[%c0_12] : memref<3xf32, #tpu.memory_space<smem>>
    %29 = vector.broadcast %28 : f32 to vector<64x1xf32>
    %30 = arith.addf %27, %29 : vector<64x1xf32>
    %31 = vector.extract_strided_slice %20 {offsets = [0, 0], sizes = [64, 1], strides = [1, 1]} : vector<64x3xf32> to vector<64x1xf32>
    %32 = arith.mulf %31, %30 : vector<64x1xf32>
    %33 = arith.addf %24, %32 : vector<64x1xf32>
    %34 = vector.extract_strided_slice %23 {offsets = [0, 128], sizes = [64, 128], strides = [1, 1]} : vector<64x384xf32> to vector<64x128xf32>
    %cst_13 = arith.constant dense<0.000000e+00> : vector<64xf32>
    %35 = vector.multi_reduction <add>, %34, %cst_13 [1] : vector<64x128xf32> to vector<64xf32>
    %36 = vector.shape_cast %35 : vector<64xf32> to vector<64x1xf32>
    %c1 = arith.constant 1 : index
    %37 = memref.load %arg4[%c1] : memref<3xf32, #tpu.memory_space<smem>>
    %38 = vector.broadcast %37 : f32 to vector<64x1xf32>
    %39 = arith.addf %36, %38 : vector<64x1xf32>
    %40 = vector.extract_strided_slice %20 {offsets = [0, 1], sizes = [64, 1], strides = [1, 1]} : vector<64x3xf32> to vector<64x1xf32>
    %41 = arith.mulf %40, %39 : vector<64x1xf32>
    %42 = arith.addf %33, %41 : vector<64x1xf32>
    %43 = vector.extract_strided_slice %23 {offsets = [0, 256], sizes = [64, 128], strides = [1, 1]} : vector<64x384xf32> to vector<64x128xf32>
    %cst_14 = arith.constant dense<0.000000e+00> : vector<64xf32>
    %44 = vector.multi_reduction <add>, %43, %cst_14 [1] : vector<64x128xf32> to vector<64xf32>
    %45 = vector.shape_cast %44 : vector<64xf32> to vector<64x1xf32>
    %c2 = arith.constant 2 : index
    %46 = memref.load %arg4[%c2] : memref<3xf32, #tpu.memory_space<smem>>
    %47 = vector.broadcast %46 : f32 to vector<64x1xf32>
    %48 = arith.addf %45, %47 : vector<64x1xf32>
    %49 = vector.extract_strided_slice %20 {offsets = [0, 2], sizes = [64, 1], strides = [1, 1]} : vector<64x3xf32> to vector<64x1xf32>
    %50 = arith.mulf %49, %48 : vector<64x1xf32>
    %51 = arith.addf %42, %50 : vector<64x1xf32>
    %c0_15 = arith.constant 0 : index
    %c0_16 = arith.constant 0 : index
    %52 = vector.load %arg5[%c0_15, %c0_16] : memref<64x1xf32, #tpu.memory_space<vmem>>, vector<64x1xf32>
    tpu.vector_store %arg5[%c0_15, %c0_16], %51 {strides = array<i32>} : memref<64x1xf32, #tpu.memory_space<vmem>>, vector<64x1xf32>,
    return
  }
}

</mosaic_0001>

<bundles_post_ra>
// kernel: moe_forward.1
= control target key start
LH: loop header
LB: loop body
LE: loop exit
PB: predicated region body
PF: predicated region fallthrough
CT: control target
= control target key end

     0   :  { %10 = vsyncpa [#allocation3], 0  ;;  %s1046_s0 = inlined_call_operand.vmem [shape: f32[64,10], index: 0, kind: input, shape index: {}]   ;;  %s1047_s1 = inlined_call_operand.vmem [shape: bf16[10,512], index: 1, kind: input, shape index: {}]   ;;  %s1048_s2 = inlined_call_operand.vmem [shape: f32[1,512], index: 2, kind: input, shape index: {}]   ;;  %s1049_s3 = inlined_call_operand.vmem [shape: f32[1,384], index: 3, kind: input, shape index: {}]   ;;  %s1050_s4 = inlined_call_operand.vmem [shape: f32[3], index: 4, kind: input, shape index: {}]   ;;  %s1051_s5 = inlined_call_operand.vmem [shape: f32[64,1], index: 5, kind: output, shape index: {}]  }
   0x1   :  { %s25_s20 = sshll.u32 %s1050_s4, 4  ;;  %s26_s20 = int_to_ptr.vmem [resolvable:$true] %s25_s20 }
   0x2   :  { %s676_s21 = scalar_lea.vmem %s26_s20, 16  ;;  %p681_p1 = scmp.lt.s32.totalorder %s26_s20, %s26_s20 }
   0x3   :  { %p677_p0 = scmp.ne.s32.totalorder %s26_s20, %s676_s21  ;;  %p682_p2 = scmp.lt.s32.totalorder %s676_s21, %s676_s21 }
   0x5   :  { %p683_p3 = por %p682_p2, %p681_p1 }
   0x7   :  { %p684_p4 = pnand %p683_p3, %p677_p0 }
   0x9   :  { %687 = shalt.err (!%p684_p4)
}
   0xa   :  { %s690_s22 = smov [#allocation2]  }
   0xb   :  { %28 = dma.vmem_to_smem %s26_s20, 16, %s690_s22, [#allocation3]  }
   0xc   :  { %688 = dma.done.wait [#allocation3], 16  }
   0xd   :  { %689 = vsyncadd [#allocation3], 4294967280 }
   0xe   :  { %32 = sfence }
   0xf   :  { %v638_v0 = vld [vmem:[%s1047_s1 + $0xc] ss:$16 sps:$4 sm:$0x1f]   ;;  %vm101_vm0 = vcmask 1044480   ;;  %v34_v2 = vld [vmem:[%s1046_s0] sm:$0xff]  ;;  %v691_v3 = vmov 0   ;;  %v52_v19 = vlaneseq }
  0x10   :  { %v640_v1 = vld [vmem:[%s1047_s1 + $0x8] ss:$16 sps:$4 sm:$0x1f]   ;;  %627 = vmatprep.subr.msk.bf16.mxu1 %vm101_vm0, %v638_v0  ;;  %219 = vmatprep.mubr.bf16.mxu1 %v691_v3  ;;  %vm88_vm1 = vcmask 80896   ;;  %v36_v10 = vld [vmem:[%s1046_s0 + $0x10] sm:$0xff]  ;;  %v38_v13 = vld [vmem:[%s1046_s0 + $0x20] sm:$0xff] }
  0x11   :  { %v35_v4 = vld [vmem:[%s1046_s0 + $0x8] sm:$0xff]  ;;  %v109_v5 = vsel %vm101_vm0, %v640_v1, 0  ;;  %146 = vmatprep.mubr.bf16.mxu0 %v691_v3  ;;  %v641_v7 = vld [vmem:[%s1047_s1 + $0x4] ss:$16 sps:$4 sm:$0x1f]   ;;  %v37_v11 = vld [vmem:[%s1046_s0 + $0x18] sm:$0xff] }
  0x12   :  { %v42_v6 = vpack.c.bf16 %v35_v4, %v34_v2  ;;  %188 = vmatpush1.bf16.msra.mxu1 %v109_v5  ;;  %v643_v8 = vld [vmem:[%s1047_s1] ss:$16 sps:$4 sm:$0x1f]   ;;  %622 = vmatprep.subr.msk.bf16.mxu0 %vm101_vm0, %v641_v7  ;;  %v43_v12 = vpack.c.bf16 %v37_v11, %v36_v10  ;;  %v39_v14 = vld [vmem:[%s1046_s0 + $0x28] sm:$0xff]  ;;  %v41_v17 = vld [vmem:[%s1046_s0 + $0x38] sm:$0xff]  ;;  %v775_v20 = vshrl.u32 %v52_v19, 7 }
  0x13   :  { %v103_v9 = vsel %vm101_vm0, %v643_v8, 0  ;;  %v44_v15 = vpack.c.bf16 %v39_v14, %v38_v13  ;;  %v40_v16 = vld [vmem:[%s1046_s0 + $0x30] sm:$0xff]  ;;  %v781_v22 = vld [vmem:[%s1048_s2] sm:$0xf]  ;;  %vm284_vm2 = vcmask 23552   ;;  %s633_s22 = sld [smem:[#allocation2 + $0x2]] }
  0x14   :  { %115 = vmatpush1.bf16.msra.mxu0 %v103_v9  ;;  %v45_v18 = vpack.c.bf16 %v41_v17, %v40_v16  ;;  %v66_v21 = vsub.s32 3, %v775_v20  ;;  %v58_v44 = vsub.s32 1, %v775_v20  ;;  %v839_v1 = vld [vmem:[%s1049_s3] sm:$0x7]  ;;  %s632_s3 = sld [smem:[#allocation2 + $0x1]]  ;;  %s692_s23 = smov 127  }
  0x15   :  { %628 = vmatmul.mubr.msk.bf16.vlgmr.msra.gmra.mrb[0].mxu1 %vm88_vm1, %v42_v6  ;;  %s693_s24 = smov 126   ;;  %s430_s25 = sld [smem:[#allocation2]]  ;;  %vm604_vm3 = vcmask 7168  }
  0x16   :  { %229 = vmatprep.mubr.bf16.mxu1 %v691_v3  ;;  %v67_v23 = vrot.slane %v781_v22, %v66_v21  ;;  %v59_v51 = vrot.slane %v781_v22, %v58_v44  ;;  %v382_v5 = vrot.slane %v839_v1, %v58_v44 }
  0x17   :  { %623 = vmatmul.mubr.msk.bf16.vlgmr.msra.gmra.mrb[0].mxu0 %vm88_vm1, %v42_v6 }
  0x18   :  { %156 = vmatprep.mubr.bf16.mxu0 %v691_v3 }
  0x1d   :  { %629 = vmatmul.mubr.msk.bf16.gmra.mrb[4].mxu1 %vm88_vm1, %v43_v12 }
  0x1e   :  { %239 = vmatprep.mubr.bf16.mxu1 %v691_v3 }
  0x1f   :  { %624 = vmatmul.mubr.msk.bf16.gmra.mrb[4].mxu0 %vm88_vm1, %v43_v12 }
  0x20   :  { %166 = vmatprep.mubr.bf16.mxu0 %v691_v3 }
  0x25   :  { %630 = vmatmul.mubr.msk.bf16.gmra.mrb[8].mxu1 %vm88_vm1, %v44_v15 }
  0x26   :  { %249 = vmatprep.mubr.bf16.mxu1 %v691_v3 }
  0x27   :  { %625 = vmatmul.mubr.msk.bf16.gmra.mrb[8].mxu0 %vm88_vm1, %v44_v15 }
  0x28   :  { %176 = vmatprep.mubr.bf16.mxu0 %v691_v3 }
  0x2d   :  { %631 = vmatmul.mubr.msk.bf16.gmra.mrb[12].mxu1 %vm88_vm1, %v45_v18 }
  0x2f   :  { %626 = vmatmul.mubr.msk.bf16.gmra.mrb[12].mxu0 %vm88_vm1, %v45_v18 }
  0xe8   :  { %v784_v24 = vpop.f32.mrb[0].mxu1 }
  0xe9   :  { %v223_v25 = vpop.f32.mrb[1].mxu1 }
  0xea   :  { %v786_v26 = vadd.f32 %v223_v25, %v67_v23  ;;  %v788_v27 = vpop.f32.mrb[2].mxu1  ;;  %v794_v31 = vpop.f32.mrb[0].mxu0 }
  0xeb   :  { %v227_v28 = vpop.f32.mrb[3].mxu1  ;;  %v150_v32 = vpop.f32.mrb[1].mxu0 }
  0xec   :  { %v790_v29 = vadd.f32 %v227_v28, %v67_v23  ;;  %v285_v30 = vsel %vm284_vm2, %v786_v26, -inf  ;;  %v796_v33 = vpop.f32.mrb[2].mxu0  ;;  %v151_v58 = vadd.f32 %v150_v32, %v59_v51 }
  0xed   :  { %286 = vmax.xlane.f32.xlu0 %v285_v30  ;;  %v154_v34 = vpop.f32.mrb[3].mxu0 }
  0xee   :  { %v288_v36 = vsel %vm284_vm2, %v790_v29, -inf  ;;  %v155_v62 = vadd.f32 %v154_v34, %v59_v51  ;;  %v261_v3 = vmax.f32 %v151_v58, 0.0 }
  0xf0   :  { %v798_v35 = vpop.f32.mrb[4].mxu1  ;;  %v264_v9 = vmax.f32 %v155_v62, 0.0  ;;  %v391_v15 = vmul.f32 %v382_v5, %v261_v3 }
  0xf1   :  { %v233_v37 = vpop.f32.mrb[5].mxu1  ;;  %289 = vmax.xlane.f32.xlu0 %v288_v36 }
  0xf2   :  { %v802_v38 = vadd.f32 %v233_v37, %v67_v23  ;;  %v804_v39 = vpop.f32.mrb[6].mxu1  ;;  %v810_v43 = vpop.f32.mrb[4].mxu0  ;;  %v394_v21 = vmul.f32 %v382_v5, %v264_v9 }
  0xf3   :  { %v237_v40 = vpop.f32.mrb[7].mxu1  ;;  %v160_v45 = vpop.f32.mrb[5].mxu0 }
  0xf4   :  { %v806_v41 = vadd.f32 %v237_v40, %v67_v23  ;;  %v291_v42 = vsel %vm284_vm2, %v802_v38, -inf  ;;  %v813_v46 = vpop.f32.mrb[6].mxu0  ;;  %v161_v4 = vadd.f32 %v160_v45, %v59_v51 }
  0xf5   :  { %292 = vmax.xlane.f32.xlu1 %v291_v42  ;;  %v164_v47 = vpop.f32.mrb[7].mxu0 }
  0xf6   :  { %v294_v49 = vsel %vm284_vm2, %v806_v41, -inf  ;;  %v165_v10 = vadd.f32 %v164_v47, %v59_v51  ;;  %v267_v14 = vmax.f32 %v161_v4, 0.0 }
  0xf8   :  { %v815_v48 = vpop.f32.mrb[8].mxu1  ;;  %v270_v25 = vmax.f32 %v165_v10, 0.0  ;;  %v397_v32 = vmul.f32 %v382_v5, %v267_v14 }
  0xf9   :  { %v243_v50 = vpop.f32.mrb[9].mxu1  ;;  %295 = vmax.xlane.f32.xlu1 %v294_v49 }
  0xfa   :  { %v820_v52 = vadd.f32 %v243_v50, %v67_v23  ;;  %v822_v53 = vpop.f32.mrb[10].mxu1  ;;  %v828_v57 = vpop.f32.mrb[8].mxu0  ;;  %v400_v36 = vmul.f32 %v382_v5, %v270_v25 }
  0xfb   :  { %v247_v54 = vpop.f32.mrb[11].mxu1  ;;  %v170_v59 = vpop.f32.mrb[9].mxu0 }
  0xfc   :  { %v824_v55 = vadd.f32 %v247_v54, %v67_v23  ;;  %v297_v56 = vsel %vm284_vm2, %v820_v52, -inf  ;;  %v832_v61 = vpop.f32.mrb[10].mxu0  ;;  %v171_v16 = vadd.f32 %v170_v59, %v59_v51 }
  0xfd   :  { %298 = vmax.xlane.f32.xlu0 %v297_v56  ;;  %v174_v63 = vpop.f32.mrb[11].mxu0 }
  0xfe   :  { %v300_v60 = vsel %vm284_vm2, %v824_v55, -inf  ;;  %v273_v30 = vmax.f32 %v171_v16, 0.0 }
  0xff   :  { %301 = vmax.xlane.f32.xlu1 %v300_v60 }
 0x100   :  { %v834_v0 = vpop.f32.mrb[12].mxu1  ;;  %v403_v44 = vmul.f32 %v382_v5, %v273_v30 }
 0x101   :  { %v253_v2 = vpop.f32.mrb[13].mxu1 }
 0x102   :  { %v842_v6 = vadd.f32 %v253_v2, %v67_v23  ;;  %v844_v7 = vpop.f32.mrb[14].mxu1  ;;  %v850_v13 = vpop.f32.mrb[12].mxu0 }
 0x103   :  { %v257_v8 = vpop.f32.mrb[15].mxu1  ;;  %v180_v17 = vpop.f32.mrb[13].mxu0 }
 0x104   :  { %v846_v11 = vadd.f32 %v257_v8, %v67_v23  ;;  %v303_v12 = vsel %vm284_vm2, %v842_v6, -inf  ;;  %v854_v19 = vpop.f32.mrb[14].mxu0  ;;  %v175_v23 = vadd.f32 %v174_v63, %v59_v51  ;;  %v181_v34 = vadd.f32 %v180_v17, %v59_v51 }
 0x105   :  { %304 = vmax.xlane.f32.xlu0 %v303_v12  ;;  %v184_v28 = vpop.f32.mrb[15].mxu0  ;;  %v62_v17 = vsub.s32 2, %v775_v20 }
 0x106   :  { %v306_v18 = vsel %vm284_vm2, %v846_v11, -inf  ;;  %v276_v37 = vmax.f32 %v175_v23, 0.0  ;;  %v185_v40 = vadd.f32 %v184_v28, %v59_v51  ;;  %v279_v42 = vmax.f32 %v181_v34, 0.0 }
 0x107   :  { %307 = vmax.xlane.f32.xlu1 %v306_v18  ;;  %v63_v23 = vrot.slane %v781_v22, %v62_v17 }
 0x108   :  { %v406_v45 = vmul.f32 %v382_v5, %v276_v37  ;;  %v282_v47 = vmax.f32 %v185_v40, 0.0  ;;  %v409_v49 = vmul.f32 %v382_v5, %v279_v42 }
 0x109   :  { %456 = vadd.xlane.f32.xlu0 %v391_v15  ;;  %v226_v34 = vadd.f32 %v788_v27, %v63_v23  ;;  %v222_v27 = vadd.f32 %v784_v24, %v63_v23 }
 0x10a   :  { %v412_v50 = vmul.f32 %v382_v5, %v282_v47 }
 0x10b   :  { %458 = vadd.xlane.f32.xlu1 %v394_v21  ;;  %v265_v42 = vmax.f32 %v226_v34, 0.0 }
 0x10d   :  { %460 = vadd.xlane.f32.xlu0 %v397_v32 }
 0x10f   :  { %462 = vadd.xlane.f32.xlu1 %v400_v36 }
 0x111   :  { %464 = vadd.xlane.f32.xlu0 %v403_v44  ;;  %v236_v44 = vadd.f32 %v804_v39, %v63_v23 }
 0x113   :  { %466 = vadd.xlane.f32.xlu1 %v406_v45  ;;  %v386_v45 = vrot.slane %v839_v1, %v62_v17  ;;  %v271_v47 = vmax.f32 %v236_v44, 0.0 }
 0x115   :  { %468 = vadd.xlane.f32.xlu0 %v409_v49  ;;  %v395_v49 = vmul.f32 %v386_v45, %v265_v42  ;;  %v401_v24 = vmul.f32 %v386_v45, %v271_v47 }
 0x117   :  { %470 = vadd.xlane.f32.xlu1 %v412_v50 }
 0x17a   :  { %v287_v54 = vpop.xlane.xlu0 %286 }
 0x17b   :  { %v309_v56 = vsub.f32 %v786_v26, %v287_v54  ;;  %v262_v54 = vmax.f32 %v222_v27, 0.0 }
 0x17d   :  { %v317_v58 = vmul.f32 1.442695, %v309_v56  ;;  %v232_v56 = vadd.f32 %v798_v35, %v63_v23  ;;  %v256_v35 = vadd.f32 %v844_v7, %v63_v23 }
 0x17e   :  { %v290_v59 = vpop.xlane.xlu0 %289 }
 0x17f   :  { %644 = vpow2.f32 %v317_v58  ;;  %v310_v51 = vsub.f32 %v790_v29, %v290_v59  ;;  %v246_v58 = vadd.f32 %v822_v53, %v63_v23  ;;  %v54_v59 = vsub.s32 0, %v775_v20 }
 0x180   :  { %v252_v20 = vadd.f32 %v834_v0, %v63_v23 }
 0x181   :  { %v319_v60 = vmul.f32 1.442695, %v310_v51 }
 0x182   :  { %v293_v62 = vpop.xlane.xlu1 %292 }
 0x183   :  { %646 = vpow2.f32 %v319_v60  ;;  %v311_v63 = vsub.f32 %v802_v38, %v293_v62  ;;  %v268_v60 = vmax.f32 %v232_v56, 0.0  ;;  %v242_v62 = vadd.f32 %v815_v48, %v63_v23 }
 0x184   :  { %v926_v56 = vstv %s632_s3 }
 0x185   :  { %v321_v2 = vmul.f32 1.442695, %v311_v63  ;;  %v392_v63 = vmul.f32 %v386_v45, %v262_v54 }
 0x186   :  { %v296_v3 = vpop.xlane.xlu1 %295 }
 0x187   :  { %648 = vpow2.f32 %v321_v2  ;;  %v312_v4 = vsub.f32 %v806_v41, %v296_v3  ;;  %v277_v2 = vmax.f32 %v246_v58, 0.0  ;;  %v55_v3 = vrot.slane %v781_v22, %v54_v59 }
 0x189   :  { %v860_v5 = vpop.eup %644  ;;  %v323_v8 = vmul.f32 1.442695, %v312_v4  ;;  %v274_v4 = vmax.f32 %v242_v62, 0.0  ;;  %v407_v48 = vmul.f32 %v386_v45, %v277_v2  ;;  %v183_v23 = vadd.f32 %v854_v19, %v55_v3 }
 0x18a   :  { %v299_v9 = vpop.xlane.xlu0 %298  ;;  %v333_v26 = vsel %vm284_vm2, %v860_v5, 0.0 }
 0x18b   :  { %650 = vpow2.f32 %v323_v8  ;;  %v313_v29 = vsub.f32 %v820_v52, %v299_v9  ;;  %334 = vadd.xlane.f32.xlu0 %v333_v26  ;;  %v398_v8 = vmul.f32 %v386_v45, %v268_v60  ;;  %v283_v9 = vmax.f32 %v256_v35, 0.0 }
 0x18c   :  { %v302_v10 = vpop.xlane.xlu1 %301  ;;  %v153_v26 = vadd.f32 %v796_v33, %v55_v3  ;;  %v404_v7 = vmul.f32 %v386_v45, %v274_v4 }
 0x18d   :  { %v865_v12 = vpop.eup %646  ;;  %v325_v38 = vmul.f32 1.442695, %v313_v29  ;;  %v314_v14 = vsub.f32 %v824_v55, %v302_v10  ;;  %v280_v29 = vmax.f32 %v252_v20, 0.0  ;;  %v149_v10 = vadd.f32 %v794_v31, %v55_v3 }
 0x18e   :  { %v336_v41 = vsel %vm284_vm2, %v865_v12, 0.0  ;;  %v263_v22 = vmax.f32 %v153_v26, 0.0 }
 0x18f   :  { %652 = vpow2.f32 %v325_v38  ;;  %v327_v15 = vmul.f32 1.442695, %v314_v14  ;;  %337 = vadd.xlane.f32.xlu1 %v336_v41  ;;  %v163_v38 = vadd.f32 %v813_v46, %v55_v3  ;;  %v413_v14 = vmul.f32 %v386_v45, %v283_v9 }
 0x190   :  { %v378_v41 = vrot.slane %v839_v1, %v54_v59  ;;  %v260_v0 = vmax.f32 %v149_v10, 0.0  ;;  %v410_v17 = vmul.f32 %v386_v45, %v280_v29 }
 0x191   :  { %v870_v16 = vpop.eup %648  ;;  %654 = vpow2.f32 %v327_v15  ;;  %v159_v15 = vadd.f32 %v810_v43, %v55_v3  ;;  %v269_v33 = vmax.f32 %v163_v38, 0.0  ;;  %v179_v43 = vadd.f32 %v850_v13, %v55_v3 }
 0x192   :  { %v305_v18 = vpop.xlane.xlu0 %304  ;;  %v339_v52 = vsel %vm284_vm2, %v870_v16, 0.0 }
 0x193   :  { %v315_v21 = vsub.f32 %v842_v6, %v305_v18  ;;  %340 = vadd.xlane.f32.xlu0 %v339_v52  ;;  %v173_v18 = vadd.f32 %v832_v61, %v55_v3  ;;  %v393_v52 = vmul.f32 %v378_v41, %v263_v22  ;;  %v266_v31 = vmax.f32 %v159_v15, 0.0 }
 0x194   :  { %v308_v25 = vpop.xlane.xlu1 %307  ;;  %v399_v1 = vmul.f32 %v378_v41, %v269_v33  ;;  %v278_v34 = vmax.f32 %v179_v43, 0.0 }
 0x195   :  { %v876_v55 = vpop.eup %650  ;;  %v329_v28 = vmul.f32 1.442695, %v315_v21  ;;  %v316_v30 = vsub.f32 %v846_v11, %v308_v25  ;;  %v169_v21 = vadd.f32 %v828_v57, %v55_v3  ;;  %v390_v25 = vmul.f32 %v378_v41, %v260_v0 }
 0x196   :  { %v342_v32 = vsel %vm284_vm2, %v876_v55, 0.0  ;;  %v275_v46 = vmax.f32 %v173_v18, 0.0  ;;  %v457_v42 = vpop.xlane.xlu0 %456 }
 0x197   :  { %656 = vpow2.f32 %v329_v28  ;;  %v331_v36 = vmul.f32 1.442695, %v316_v30  ;;  %343 = vadd.xlane.f32.xlu1 %v342_v32  ;;  %v272_v28 = vmax.f32 %v169_v21, 0.0  ;;  %v396_v30 = vmul.f32 %v378_v41, %v266_v31 }
 0x198   :  { %v281_v32 = vmax.f32 %v183_v23, 0.0  ;;  %v405_v61 = vmul.f32 %v378_v41, %v275_v46  ;;  %v459_v44 = vpop.xlane.xlu1 %458  ;;  %v474_v59 = vadd.f32 %v926_v56, %v457_v42 }
 0x199   :  { %v883_v37 = vpop.eup %652  ;;  %658 = vpow2.f32 %v331_v36  ;;  %v402_v36 = vmul.f32 %v378_v41, %v272_v28  ;;  %v475_v2 = vadd.f32 %v926_v56, %v459_v44 }
 0x19a   :  { %v345_v6 = vsel %vm284_vm2, %v883_v37, 0.0  ;;  %v411_v57 = vmul.f32 %v378_v41, %v281_v32  ;;  %v461_v19 = vpop.xlane.xlu0 %460 }
 0x19b   :  { %v887_v40 = vpop.eup %654  ;;  %346 = vadd.xlane.f32.xlu0 %v345_v6  ;;  %v408_v6 = vmul.f32 %v378_v41, %v278_v34 }
 0x19c   :  { %v348_v11 = vsel %vm284_vm2, %v887_v40, 0.0  ;;  %v463_v27 = vpop.xlane.xlu1 %462 }
 0x19d   :  { %349 = vadd.xlane.f32.xlu1 %v348_v11 }
 0x19e   :  { %v918_v11 = vpop.xlane.xlu0 %464 }
 0x19f   :  { %v478_v23 = vadd.f32 %v926_v56, %v918_v11 }
 0x1a0   :  { %v920_v13 = vpop.xlane.xlu1 %466 }
 0x1a1   :  { %v894_v50 = vpop.eup %656  ;;  %532 = vadd.xlane.f32.xlu1 %v395_v49 }
 0x1a2   :  { %v351_v39 = vsel %vm284_vm2, %v894_v50, 0.0  ;;  %v922_v45 = vpop.xlane.xlu0 %468 }
 0x1a3   :  { %352 = vadd.xlane.f32.xlu0 %v351_v39  ;;  %v901_v51 = vpop.eup %658 }
 0x1a4   :  { %v354_v53 = vsel %vm284_vm2, %v901_v51, 0.0  ;;  %v924_v47 = vpop.xlane.xlu1 %470 }
 0x1a5   :  { %536 = vadd.xlane.f32.xlu1 %v401_v24 }
 0x1a7   :  { %530 = vadd.xlane.f32.xlu0 %v392_v63 }
 0x1a9   :  { %355 = vadd.xlane.f32.xlu1 %v354_v53 }
 0x1ab   :  { %534 = vadd.xlane.f32.xlu0 %v398_v8 }
 0x1ad   :  { %540 = vadd.xlane.f32.xlu1 %v407_v48 }
 0x1af   :  { %538 = vadd.xlane.f32.xlu0 %v404_v7  ;;  %v476_v7 = vadd.f32 %v926_v56, %v461_v19  ;;  %v480_v19 = vadd.f32 %v926_v56, %v922_v45 }
 0x1b1   :  { %544 = vadd.xlane.f32.xlu1 %v413_v14 }
 0x1b3   :  { %542 = vadd.xlane.f32.xlu0 %v410_v17 }
 0x1b5   :  { %416 = vadd.xlane.f32.xlu1 %v393_v52 }
 0x1b7   :  { %414 = vadd.xlane.f32.xlu0 %v390_v25 }
 0x1b9   :  { %420 = vadd.xlane.f32.xlu1 %v399_v1 }
 0x1bb   :  { %418 = vadd.xlane.f32.xlu0 %v396_v30  ;;  %v479_v30 = vadd.f32 %v926_v56, %v920_v13 }
 0x1bd   :  { %424 = vadd.xlane.f32.xlu1 %v405_v61 }
 0x1bf   :  { %422 = vadd.xlane.f32.xlu0 %v402_v36 }
 0x1c1   :  { %428 = vadd.xlane.f32.xlu1 %v411_v57 }
 0x1c3   :  { %426 = vadd.xlane.f32.xlu0 %v408_v6 }
 0x218   :  { %v335_v49 = vpop.xlane.xlu0 %334 }
 0x219   :  { %660 = vrcp.f32 %v335_v49 }
 0x21c   :  { %v338_v54 = vpop.xlane.xlu1 %337 }
 0x21d   :  { %662 = vrcp.f32 %v338_v54 }
 0x220   :  { %v341_v39 = vpop.xlane.xlu0 %340 }
 0x221   :  { %664 = vrcp.f32 %v341_v39 }
 0x223   :  { %v661_v58 = vpop.eup %660 }
 0x224   :  { %v930_v24 = vmul.f32 %v661_v58, %v860_v5  ;;  %v344_v60 = vpop.xlane.xlu1 %343  ;;  %v940_v5 = vstv %s633_s22 }
 0x225   :  { %666 = vrcp.f32 %v344_v60 }
 0x226   :  { %v482_v62 = vmul.f32 %v474_v59, %v930_v24 }
 0x227   :  { %v663_v63 = vpop.eup %662 }
 0x228   :  { %498 = vrot.lane.b32.xlu0 %v482_v62, %s692_s23  ;;  %v936_v35 = vmul.f32 %v663_v63, %v865_v12  ;;  %v347_v4 = vpop.xlane.xlu0 %346  ;;  %v431_v62 = vstv %s430_s25 }
 0x229   :  { %668 = vrcp.f32 %v347_v4 }
 0x22a   :  { %v350_v3 = vpop.xlane.xlu1 %349  ;;  %v483_v53 = vmul.f32 %v475_v2, %v936_v35 }
 0x22b   :  { %v665_v20 = vpop.eup %664  ;;  %670 = vrcp.f32 %v350_v3 }
 0x22c   :  { %500 = vrot.lane.b32.xlu1 %v483_v53, %s692_s23  ;;  %v945_v12 = vmul.f32 %v665_v20, %v870_v16  ;;  %v477_v16 = vadd.f32 %v926_v56, %v463_v27  ;;  %v481_v27 = vadd.f32 %v926_v56, %v924_v47 }
 0x22e   :  { %v533_v8 = vpop.xlane.xlu1 %532  ;;  %v484_v41 = vmul.f32 %v476_v7, %v945_v12 }
 0x22f   :  { %v549_v9 = vadd.f32 %v940_v5, %v533_v8  ;;  %v667_v29 = vpop.eup %666 }
 0x230   :  { %v353_v26 = vpop.xlane.xlu0 %352  ;;  %v950_v38 = vmul.f32 %v667_v29, %v876_v55 }
 0x231   :  { %v557_v48 = vmul.f32 %v549_v9, %v936_v35  ;;  %672 = vrcp.f32 %v353_v26 }
 0x232   :  { %v537_v10 = vpop.xlane.xlu1 %536  ;;  %v485_v52 = vmul.f32 %v477_v16, %v950_v38 }
 0x233   :  { %574 = vrot.lane.b32.xlu1 %v557_v48, %s693_s24  ;;  %v669_v17 = vpop.eup %668  ;;  %v551_v18 = vadd.f32 %v940_v5, %v537_v10 }
 0x234   :  { %v531_v22 = vpop.xlane.xlu0 %530  ;;  %v964_v25 = vmul.f32 %v669_v17, %v883_v37 }
 0x235   :  { %v548_v14 = vadd.f32 %v940_v5, %v531_v22  ;;  %v671_v31 = vpop.eup %670  ;;  %v559_v1 = vmul.f32 %v551_v18, %v950_v38 }
 0x236   :  { %v356_v0 = vpop.xlane.xlu1 %355  ;;  %v970_v28 = vmul.f32 %v671_v31, %v887_v40  ;;  %v486_v37 = vmul.f32 %v478_v23, %v964_v25 }
 0x237   :  { %v556_v15 = vmul.f32 %v548_v14, %v930_v24  ;;  %502 = vrot.lane.b32.xlu1 %v484_v41, %s692_s23  ;;  %674 = vrcp.f32 %v356_v0 }
 0x238   :  { %v535_v33 = vpop.xlane.xlu0 %534  ;;  %v487_v40 = vmul.f32 %v479_v30, %v970_v28 }
 0x239   :  { %v550_v55 = vadd.f32 %v940_v5, %v535_v33  ;;  %572 = vrot.lane.b32.xlu0 %v556_v15, %s693_s24 }
 0x23a   :  { %v541_v43 = vpop.xlane.xlu1 %540 }
 0x23b   :  { %v558_v21 = vmul.f32 %v550_v55, %v945_v12  ;;  %504 = vrot.lane.b32.xlu1 %v485_v52, %s692_s23  ;;  %v673_v61 = vpop.eup %672  ;;  %v553_v34 = vadd.f32 %v940_v5, %v541_v43 }
 0x23c   :  { %v539_v46 = vpop.xlane.xlu0 %538  ;;  %v983_v6 = vmul.f32 %v673_v61, %v894_v50 }
 0x23d   :  { %576 = vrot.lane.b32.xlu0 %v558_v21, %s693_s24  ;;  %v552_v32 = vadd.f32 %v940_v5, %v539_v46  ;;  %v561_v44 = vmul.f32 %v553_v34, %v970_v28 }
 0x23e   :  { %v488_v50 = vmul.f32 %v480_v19, %v983_v6  ;;  %v545_v49 = vpop.xlane.xlu1 %544 }
 0x23f   :  { %578 = vrot.lane.b32.xlu1 %v559_v1, %s693_s24  ;;  %v560_v57 = vmul.f32 %v552_v32, %v964_v25  ;;  %v555_v54 = vadd.f32 %v940_v5, %v545_v49 }
 0x240   :  { %v543_v42 = vpop.xlane.xlu0 %542 }
 0x241   :  { %506 = vrot.lane.b32.xlu0 %v486_v37, %s692_s23  ;;  %v675_v36 = vpop.eup %674  ;;  %v554_v13 = vadd.f32 %v940_v5, %v543_v42 }
 0x242   :  { %v990_v11 = vmul.f32 %v675_v36, %v901_v51  ;;  %v417_v47 = vpop.xlane.xlu1 %416 }
 0x243   :  { %508 = vrot.lane.b32.xlu1 %v487_v40, %s692_s23  ;;  %v562_v51 = vmul.f32 %v554_v13, %v983_v6  ;;  %v433_v3 = vadd.f32 %v431_v62, %v417_v47 }
 0x244   :  { %v489_v45 = vmul.f32 %v481_v27, %v990_v11  ;;  %v563_v39 = vmul.f32 %v555_v54, %v990_v11  ;;  %v415_v56 = vpop.xlane.xlu0 %414 }
 0x245   :  { %580 = vrot.lane.b32.xlu0 %v560_v57, %s693_s24  ;;  %v441_v4 = vmul.f32 %v433_v3, %v936_v35  ;;  %v432_v20 = vadd.f32 %v431_v62, %v415_v56 }
 0x246   :  { %v421_v58 = vpop.xlane.xlu1 %420 }
 0x247   :  { %582 = vrot.lane.b32.xlu1 %v561_v44, %s693_s24  ;;  %v440_v10 = vmul.f32 %v432_v20, %v930_v24  ;;  %v435_v22 = vadd.f32 %v431_v62, %v421_v58 }
 0x248   :  { %v419_v59 = vpop.xlane.xlu0 %418 }
 0x249   :  { %510 = vrot.lane.b32.xlu0 %v488_v50, %s692_s23  ;;  %v434_v29 = vadd.f32 %v431_v62, %v419_v59  ;;  %v443_v24 = vmul.f32 %v435_v22, %v950_v38 }
 0x24a   :  { %v425_v60 = vpop.xlane.xlu1 %424 }
 0x24b   :  { %512 = vrot.lane.b32.xlu1 %v489_v45, %s692_s23  ;;  %v442_v35 = vmul.f32 %v434_v29, %v945_v12  ;;  %v437_v31 = vadd.f32 %v431_v62, %v425_v60 }
 0x24c   :  { %v423_v63 = vpop.xlane.xlu0 %422 }
 0x24d   :  { %584 = vrot.lane.b32.xlu0 %v562_v51, %s693_s24  ;;  %v436_v33 = vadd.f32 %v431_v62, %v423_v63  ;;  %v445_v1 = vmul.f32 %v437_v31, %v970_v28 }
 0x24e   :  { %v429_v2 = vpop.xlane.xlu1 %428 }
 0x24f   :  { %586 = vrot.lane.b32.xlu1 %v563_v39, %s693_s24  ;;  %v444_v38 = vmul.f32 %v436_v33, %v964_v25  ;;  %v439_v34 = vadd.f32 %v431_v62, %v429_v2 }
 0x250   :  { %v427_v5 = vpop.xlane.xlu0 %426 }
 0x251   :  { %v438_v30 = vadd.f32 %v431_v62, %v427_v5  ;;  %v447_v42 = vmul.f32 %v439_v34, %v990_v11 }
 0x253   :  { %v446_v25 = vmul.f32 %v438_v30, %v983_v6 }
 0x29a   :  { %v499_v48 = vpop.permute.xlu0 %498 }
 0x29b   :  { %v522_v14 = vadd.f32 %v499_v48, %v440_v10 }
 0x29e   :  { %v501_v53 = vpop.permute.xlu1 %500 }
 0x29f   :  { %v523_v8 = vadd.f32 %v501_v53, %v441_v4 }
 0x2a5   :  { %v575_v9 = vpop.permute.xlu1 %574 }
 0x2a6   :  { %v597_v26 = vadd.f32 %v575_v9, %v523_v8 }
 0x2a8   :  { %606 = vst.msk [vmem:[%s1051_s5 + $0x8] sm:$0xff] %vm604_vm3, %v597_v26 }
 0x2a9   :  { %v503_v7 = vpop.permute.xlu1 %502 }
 0x2aa   :  { %v524_v15 = vadd.f32 %v503_v7, %v442_v35 }
 0x2ab   :  { %v573_v41 = vpop.permute.xlu0 %572 }
 0x2ac   :  { %v596_v0 = vadd.f32 %v573_v41, %v522_v14 }
 0x2ad   :  { %v505_v16 = vpop.permute.xlu1 %504 }
 0x2ae   :  { %605 = vst.msk [vmem:[%s1051_s5] sm:$0xff] %vm604_vm3, %v596_v0  ;;  %v525_v18 = vadd.f32 %v505_v16, %v443_v24 }
 0x2af   :  { %v577_v17 = vpop.permute.xlu0 %576 }
 0x2b0   :  { %v598_v55 = vadd.f32 %v577_v17, %v524_v15 }
 0x2b1   :  { %v579_v52 = vpop.permute.xlu1 %578 }
 0x2b2   :  { %607 = vst.msk [vmem:[%s1051_s5 + $0x10] sm:$0xff] %vm604_vm3, %v598_v55  ;;  %v599_v12 = vadd.f32 %v579_v52, %v525_v18 }
 0x2b3   :  { %v507_v21 = vpop.permute.xlu0 %506 }
 0x2b4   :  { %608 = vst.msk [vmem:[%s1051_s5 + $0x18] sm:$0xff] %vm604_vm3, %v599_v12  ;;  %v526_v23 = vadd.f32 %v507_v21, %v444_v38 }
 0x2b5   :  { %v509_v46 = vpop.permute.xlu1 %508 }
 0x2b6   :  { %v527_v32 = vadd.f32 %v509_v46, %v445_v1 }
 0x2b7   :  { %v581_v43 = vpop.permute.xlu0 %580 }
 0x2b8   :  { %v600_v37 = vadd.f32 %v581_v43, %v526_v23 }
 0x2b9   :  { %v583_v61 = vpop.permute.xlu1 %582 }
 0x2ba   :  { %609 = vst.msk [vmem:[%s1051_s5 + $0x20] sm:$0xff] %vm604_vm3, %v600_v37  ;;  %v601_v40 = vadd.f32 %v583_v61, %v527_v32 }
 0x2bb   :  { %v511_v36 = vpop.permute.xlu0 %510 }
 0x2bc   :  { %610 = vst.msk [vmem:[%s1051_s5 + $0x28] sm:$0xff] %vm604_vm3, %v601_v40  ;;  %v528_v57 = vadd.f32 %v511_v36, %v446_v25 }
 0x2bd   :  { %v513_v28 = vpop.permute.xlu1 %512 }
 0x2be   :  { %v529_v44 = vadd.f32 %v513_v28, %v447_v42 }
 0x2bf   :  { %v585_v19 = vpop.permute.xlu0 %584 }
 0x2c0   :  { %v602_v27 = vadd.f32 %v585_v19, %v528_v57 }
 0x2c1   :  { %v587_v13 = vpop.permute.xlu1 %586 }
 0x2c2   :  { %611 = vst.msk [vmem:[%s1051_s5 + $0x30] sm:$0xff] %vm604_vm3, %v602_v27  ;;  %v603_v50 = vadd.f32 %v587_v13, %v529_v44 }
 0x2c4   :  { %612 = vst.msk [vmem:[%s1051_s5 + $0x38] sm:$0xff] %vm604_vm3, %v603_v50 }
 0x2c5   :  { %617 = vsyncpa [#allocation3], 1 }

</bundles_post_ra>
